<compile_context>
chip_gen: v5e
topology: v5e:2x2
jax: 0.10.0
libtpu: 0.0.40
codegen_flags: <defaults>
</compile_context>

<pallas_src>
import functools
import numpy as np
import jax
import jax.numpy as jnp
from jax.experimental import pallas as pl


def ggnn_kernel(h_ref, ann_ref, a_all_ref, m_cat_ref, bias3_ref,
                wrz_h_ref, wh_h_ref, wao_h_ref, wao_a_ref, bao_ref, seg_ref,
                out_ref, *, time_steps, num_chan, pad_w, state_dim):
    # Shapes (all static, everything resident in VMEM, grid=()):
    #   h_ref    : (BN, D)              flattened node states
    #   ann_ref  : (BN, A)
    #   a_all_ref: (BN, num_chan*BN)    column-concat of block-diag adjacency
    #                                   channels [out_0..out_{Eh-1}, in_0..in_{Eh-1}]
    #   m_cat_ref: (D, num_chan*pad_w)  per-channel fused weights W_e^T @ G_dir,
    #                                   each block zero-padded 3D -> pad_w lanes
    #   bias3_ref: (BN, pad_w)          time-invariant degree*edge_bias folded
    #                                   through G_dir + GRU biases (zero-padded)
    #   wrz_h_ref: (D, 2D)   wh_h_ref: (D, D)
    #   wao_*    : readout weight blocks, seg_ref: (B, BN) graph segment-sum
    D = state_dim

    def dot(a, b):
        return jnp.dot(a, b, preferred_element_type=jnp.float32)

    h = h_ref[...]                                               # (BN, D)

    # Static unroll over the (small) number of propagation steps; weight refs
    # are read at their point of use so no big SSA block stays live across T.
    for _ in range(time_steps):
        # (1) one lane-dense matmul: all edge-type transforms fused with the
        #     GRU a_in / a_out weight blocks.
        hm = dot(h, m_cat_ref[...])                              # (BN, NC*pad_w)
        # restack 128-aligned per-channel column blocks along sublanes
        # -> rows ordered (channel, node), matching a_all's column order.
        hm_stk = jnp.concatenate(
            [hm[:, c * pad_w:(c + 1) * pad_w] for c in range(num_chan)],
            axis=0)                                              # (NC*BN, pad_w)
        # (2) single fused adjacency aggregation + gate pre-activation matmul.
        pre = dot(a_all_ref[...], hm_stk) + bias3_ref[...]       # (BN, pad_w)
        # (3) r/z gates fused into one 2D-wide matmul on h.
        rz = jax.nn.sigmoid(pre[:, :2 * D] + dot(h, wrz_h_ref[...]))
        r = rz[:, :D]
        z = rz[:, D:2 * D]
        # (4) candidate state (the r*h term cannot be pre-fused).
        h_hat = jnp.tanh(pre[:, 2 * D:3 * D] + dot(r * h, wh_h_ref[...]))
        h = (1.0 - z) * h + z * h_hat

    # Readout (outside the T loop, tiny): sigmoid(attn) * tanh(out),
    # per-graph node sum via the segment matrix, final sigmoid.
    logits = dot(h, wao_h_ref[...]) + dot(ann_ref[...], wao_a_ref[...]) + bao_ref[...]
    mul = jax.nn.sigmoid(logits[:, 0:1]) * jnp.tanh(logits[:, 1:2])       # (BN, 1)
    out_ref[...] = jax.nn.sigmoid(dot(seg_ref[...], mul))                 # (B, 1)


def ggnn_forward(prop_state, annotation, adj, params, *, time_steps):
    """adj: dense (B, Eh, N, N) edge-type adjacency (multiplicities)."""
    B, N, D = prop_state.shape
    A = annotation.shape[-1]
    E = params["edge_w_t"].shape[0]
    Eh = E // 2
    BN = B * N
    NC = 2 * Eh                      # adjacency channels: Eh out + Eh in
    f32 = jnp.float32

    h0 = prop_state.reshape(BN, D).astype(f32)
    ann = annotation.reshape(BN, A).astype(f32)
    adj = adj.astype(f32)

    # ---- time-invariant precompute (XLA glue, hoisted out of the kernel) ----
    # GRU weight blocks (weights stored as (3D, D), row blocks = [a_in, a_out, h]).
    w_r, w_z, w_h = params["w_r"].astype(f32), params["w_z"].astype(f32), params["w_h"].astype(f32)
    g_in = jnp.concatenate([w_r[:D], w_z[:D], w_h[:D]], axis=1)            # (D, 3D)
    g_out = jnp.concatenate([w_r[D:2 * D], w_z[D:2 * D], w_h[D:2 * D]], axis=1)
    wrz_h = jnp.concatenate([w_r[2 * D:], w_z[2 * D:]], axis=1)            # (D, 2D)
    wh_h = w_h[2 * D:]                                                     # (D, D)

    # Edge-type weights folded into the GRU a_out / a_in blocks:
    #   M_c = W_edge_c^T @ G_dir  (D, 3D), channels [out_0.., in_0..].
    ewt = params["edge_w_t"].astype(f32)                                   # (2Eh, D, D)
    m_chan = jnp.concatenate(
        [jnp.einsum('edk,kf->edf', ewt[:Eh], g_out),
         jnp.einsum('edk,kf->edf', ewt[Eh:], g_in)], axis=0)               # (NC, D, 3D)
    pad_w = ((3 * D + 127) // 128) * 128                                   # lane-align blocks
    m_pad = jnp.pad(m_chan, ((0, 0), (0, 0), (0, pad_w - 3 * D)))
    m_cat = m_pad.transpose(1, 0, 2).reshape(D, NC * pad_w)                # (D, NC*pad_w)

    # Block-diagonal adjacency channels (in-direction pre-transposed), then
    # column-concatenated channel-major so the kernel does ONE aggregation dot.
    eye_b = jnp.eye(B, dtype=f32)
    a_out_bd = jnp.einsum('bejk,bc->ebjck', adj, eye_b).reshape(Eh, BN, BN)
    a_in_bd = jnp.einsum('bejk,bc->ebkcj', adj, eye_b).reshape(Eh, BN, BN)
    a_chan = jnp.concatenate([a_out_bd, a_in_bd], axis=0)                  # (NC, BN, BN)
    a_all = a_chan.transpose(1, 0, 2).reshape(BN, NC * BN)                 # (BN, NC*BN)

    # Time-invariant bias: sum_e degree_e * edge_bias_e per direction, folded
    # through the GRU blocks, plus the GRU linear biases; zero-padded to pad_w.
    eb = params["edge_bias"].astype(f32)
    deg_out = jnp.sum(adj, axis=3)                                         # (B, Eh, N)
    deg_in = jnp.sum(adj, axis=2)                                          # (B, Eh, N)
    bias_out = jnp.einsum('ben,ed->bnd', deg_out, eb[:Eh]).reshape(BN, D)
    bias_in = jnp.einsum('ben,ed->bnd', deg_in, eb[Eh:]).reshape(BN, D)
    b_gru = jnp.concatenate([params["b_r"], params["b_z"], params["b_h"]], axis=1)
    bias3 = bias_out @ g_out + bias_in @ g_in + b_gru.astype(f32)          # (BN, 3D)
    bias3 = jnp.pad(bias3, ((0, 0), (0, pad_w - 3 * D)))                   # (BN, pad_w)

    # Readout weights split into h-block and annotation-block (no concat).
    wao_h = params["w_ao"][:D].astype(f32)
    wao_a = params["w_ao"][D:].astype(f32)
    b_ao = params["b_ao"].astype(f32)
    seg = jnp.repeat(jnp.eye(B, dtype=f32), N, axis=1)                     # (B, BN)

    kernel = functools.partial(ggnn_kernel, time_steps=time_steps,
                               num_chan=NC, pad_w=pad_w, state_dim=D)

    out = pl.pallas_call(
        kernel,
        out_shape=jax.ShapeDtypeStruct((B, 1), f32),
        # grid=(): single invocation; all operands live whole in VMEM
        # (total < 100 KB — no tiling / vmem_limit tuning needed at this size).
    )(h0, ann, a_all, m_cat, bias3, wrz_h, wh_h, wao_h, wao_a, b_ao, seg)
    return out[:, 0]


def ggnn_reference(prop_state, annotation, adj, params, *, time_steps):
    """Pure-JAX reference using the same dense reformulation of the ragged loops."""
    h = prop_state
    ewt, eb = params["edge_w_t"], params["edge_bias"]
    Eh = ewt.shape[0] // 2
    w_out_t, w_in_t = ewt[:Eh], ewt[Eh:]
    b_out, b_in = eb[:Eh], eb[Eh:]
    for _ in range(time_steps):
        agg_out = jnp.einsum('bejk,bkd->bejd', adj, h)
        agg_in = jnp.einsum('bejk,bjd->bekd', adj, h)
        deg_out = jnp.sum(adj, axis=3)
        deg_in = jnp.sum(adj, axis=2)
        a_out = (jnp.einsum('bejd,edf->bjf', agg_out, w_out_t)
                 + jnp.einsum('bej,ed->bjd', deg_out, b_out))
        a_in = (jnp.einsum('bekd,edf->bkf', agg_in, w_in_t)
                + jnp.einsum('bek,ed->bkd', deg_in, b_in))
        a = jnp.concatenate([a_in, a_out, h], axis=2)
        r = jax.nn.sigmoid(a @ params["w_r"] + params["b_r"])
        z = jax.nn.sigmoid(a @ params["w_z"] + params["b_z"])
        joined = jnp.concatenate([a_in, a_out, r * h], axis=2)
        h_hat = jnp.tanh(joined @ params["w_h"] + params["b_h"])
        h = (1.0 - z) * h + z * h_hat
    join = jnp.concatenate([h, annotation], axis=2)
    logits = join @ params["w_ao"] + params["b_ao"]
    mul = jax.nn.sigmoid(logits[..., 0:1]) * jnp.tanh(logits[..., 1:2])
    n_node = prop_state.shape[1]
    w_sum = jnp.sum(mul.reshape(-1, n_node), axis=1)
    return jax.nn.sigmoid(w_sum)


if __name__ == "__main__":
    key = jax.random.PRNGKey(0)
    B, N = 2, 8          # batch, n_node
    D, A = 32, 8         # state_dim, annotation_dim
    E = 4                # num_edge_types (edge types 1..E//2 appear in the graph)
    Eh = E // 2
    T = 3                # n_steps (time_steps)

    keys = jax.random.split(key, 12)
    s = 0.2
    params = {
        # edgeEmbed weight reshaped to (E, D, D) and pre-transposed (W.T per type)
        "edge_w_t": jax.random.normal(keys[0], (E, D, D), jnp.float32) * s,
        "edge_bias": jax.random.normal(keys[1], (E, D), jnp.float32) * s,   # use_bias=True
        # Propagator gate linears, stored as [3D, D] (already transposed)
        "w_r": jax.random.normal(keys[2], (3 * D, D), jnp.float32) * s,
        "b_r": jax.random.normal(keys[3], (1, D), jnp.float32) * s,
        "w_z": jax.random.normal(keys[4], (3 * D, D), jnp.float32) * s,
        "b_z": jax.random.normal(keys[5], (1, D), jnp.float32) * s,
        "w_h": jax.random.normal(keys[6], (3 * D, D), jnp.float32) * s,
        "b_h": jax.random.normal(keys[7], (1, D), jnp.float32) * s,
        # attention (col 0) and out (col 1) heads fused into one [D+A, 2] matrix
        "w_ao": jax.random.normal(keys[8], (D + A, 2), jnp.float32) * s,
        "b_ao": jax.random.normal(keys[9], (1, 2), jnp.float32) * s,
    }
    prop_state = jax.random.normal(keys[10], (B, N, D), jnp.float32) * 0.5
    annotation = jax.random.normal(keys[11], (B, N, A), jnp.float32) * 0.5

    # Deterministic ragged adjacency A[b][j] = [(edge_type, neighbour), ...]
    # densified into a [B, Eh, N, N] count tensor (glue, not compute).
    adj_np = np.zeros((B, Eh, N, N), np.float32)
    for b in range(B):
        for j in range(N):
            et = (j % Eh) + 1
            adj_np[b, et - 1, j, (j + 1 + b) % N] += 1.0
            et2 = ((j + 1) % Eh) + 1
            adj_np[b, et2 - 1, j, (j + 3) % N] += 1.0
    adj = jnp.asarray(adj_np)

    res = ggnn_forward(prop_state, annotation, adj, params, time_steps=T)
    res = jax.block_until_ready(res)

    ref = ggnn_reference(prop_state, annotation, adj, params, time_steps=T)
    if not np.allclose(np.asarray(res), np.asarray(ref), rtol=1e-2, atol=1e-2):
        raise AssertionError(f"mismatch: kernel={res} ref={ref}")
    print("KERNEL_OK")
</pallas_src>

<mosaic_0001>
module attributes {stable_mosaic.version = 11 : i64} {
  func.func @ggnn_kernel(%arg0: memref<16x32xf32, #tpu.memory_space<vmem>>, %arg1: memref<16x8xf32, #tpu.memory_space<vmem>>, %arg2: memref<16x64xf32, #tpu.memory_space<vmem>>, %arg3: memref<32x512xf32, #tpu.memory_space<vmem>>, %arg4: memref<16x128xf32, #tpu.memory_space<vmem>>, %arg5: memref<32x64xf32, #tpu.memory_space<vmem>>, %arg6: memref<32x32xf32, #tpu.memory_space<vmem>>, %arg7: memref<32x2xf32, #tpu.memory_space<vmem>>, %arg8: memref<8x2xf32, #tpu.memory_space<vmem>>, %arg9: memref<1x2xf32, #tpu.memory_space<vmem>>, %arg10: memref<2x16xf32, #tpu.memory_space<vmem>>, %arg11: memref<2x1xf32, #tpu.memory_space<vmem>>) attributes {dimension_semantics = [], scalar_prefetch = 0 : i64, scratch_operands = 0 : i64, tpu.core_type = #tpu.core_type<tc>} {
    %c0 = arith.constant 0 : index
    %c0_0 = arith.constant 0 : index
    %0 = vector.load %arg0[%c0, %c0_0] : memref<16x32xf32, #tpu.memory_space<vmem>>, vector<16x32xf32>
    %c0_1 = arith.constant 0 : index
    %c0_2 = arith.constant 0 : index
    %1 = vector.load %arg3[%c0_1, %c0_2] : memref<32x512xf32, #tpu.memory_space<vmem>>, vector<32x512xf32>
    %cst = arith.constant dense<0.000000e+00> : vector<16x512xf32>
    %2 = tpu.matmul %0, %1, %cst {dimension_numbers = #tpu.dot_dimension_numbers<[1], [0], [0], [1], [0, 0, 1, 1], [], []>} : vector<16x32xf32>, vector<32x512xf32>, vector<16x512xf32> -> vector<16x512xf32>
    %3 = vector.extract_strided_slice %2 {offsets = [0, 0], sizes = [16, 128], strides = [1, 1]} : vector<16x512xf32> to vector<16x128xf32>
    %4 = vector.extract_strided_slice %2 {offsets = [0, 128], sizes = [16, 128], strides = [1, 1]} : vector<16x512xf32> to vector<16x128xf32>
    %5 = vector.extract_strided_slice %2 {offsets = [0, 256], sizes = [16, 128], strides = [1, 1]} : vector<16x512xf32> to vector<16x128xf32>
    %6 = vector.extract_strided_slice %2 {offsets = [0, 384], sizes = [16, 128], strides = [1, 1]} : vector<16x512xf32> to vector<16x128xf32>
    %7 = tpu.concatenate %3, %4, %5, %6 in 0 : vector<16x128xf32>, vector<16x128xf32>, vector<16x128xf32>, vector<16x128xf32> -> vector<64x128xf32>
    %c0_3 = arith.constant 0 : index
    %c0_4 = arith.constant 0 : index
    %8 = vector.load %arg2[%c0_3, %c0_4] : memref<16x64xf32, #tpu.memory_space<vmem>>, vector<16x64xf32>
    %cst_5 = arith.constant dense<0.000000e+00> : vector<16x128xf32>
    %9 = tpu.matmul %8, %7, %cst_5 {dimension_numbers = #tpu.dot_dimension_numbers<[1], [0], [0], [1], [0, 0, 1, 1], [], []>} : vector<16x64xf32>, vector<64x128xf32>, vector<16x128xf32> -> vector<16x128xf32>
    %c0_6 = arith.constant 0 : index
    %c0_7 = arith.constant 0 : index
    %10 = vector.load %arg4[%c0_6, %c0_7] : memref<16x128xf32, #tpu.memory_space<vmem>>, vector<16x128xf32>
    %11 = arith.addf %9, %10 : vector<16x128xf32>
    %12 = vector.extract_strided_slice %11 {offsets = [0, 0], sizes = [16, 64], strides = [1, 1]} : vector<16x128xf32> to vector<16x64xf32>
    %c0_8 = arith.constant 0 : index
    %c0_9 = arith.constant 0 : index
    %13 = vector.load %arg5[%c0_8, %c0_9] : memref<32x64xf32, #tpu.memory_space<vmem>>, vector<32x64xf32>
    %cst_10 = arith.constant dense<0.000000e+00> : vector<16x64xf32>
    %14 = tpu.matmul %0, %13, %cst_10 {dimension_numbers = #tpu.dot_dimension_numbers<[1], [0], [0], [1], [0, 0, 1, 1], [], []>} : vector<16x32xf32>, vector<32x64xf32>, vector<16x64xf32> -> vector<16x64xf32>
    %15 = arith.addf %12, %14 : vector<16x64xf32>
    %16 = arith.negf %15 : vector<16x64xf32>
    %17 = math.exp %16 : vector<16x64xf32>
    %cst_11 = arith.constant 1.000000e+00 : f32
    %18 = vector.broadcast %cst_11 : f32 to vector<16x64xf32>
    %19 = arith.addf %18, %17 : vector<16x64xf32>
    %20 = arith.divf %18, %19 : vector<16x64xf32>
    %21 = vector.extract_strided_slice %20 {offsets = [0, 0], sizes = [16, 32], strides = [1, 1]} : vector<16x64xf32> to vector<16x32xf32>
    %22 = vector.extract_strided_slice %20 {offsets = [0, 32], sizes = [16, 32], strides = [1, 1]} : vector<16x64xf32> to vector<16x32xf32>
    %23 = vector.extract_strided_slice %11 {offsets = [0, 64], sizes = [16, 32], strides = [1, 1]} : vector<16x128xf32> to vector<16x32xf32>
    %24 = arith.mulf %21, %0 : vector<16x32xf32>
    %c0_12 = arith.constant 0 : index
    %c0_13 = arith.constant 0 : index
    %25 = vector.load %arg6[%c0_12, %c0_13] : memref<32x32xf32, #tpu.memory_space<vmem>>, vector<32x32xf32>
    %cst_14 = arith.constant dense<0.000000e+00> : vector<16x32xf32>
    %26 = tpu.matmul %24, %25, %cst_14 {dimension_numbers = #tpu.dot_dimension_numbers<[1], [0], [0], [1], [0, 0, 1, 1], [], []>} : vector<16x32xf32>, vector<32x32xf32>, vector<16x32xf32> -> vector<16x32xf32>
    %27 = arith.addf %23, %26 : vector<16x32xf32>
    %28 = math.tanh %27 : vector<16x32xf32>
    %cst_15 = arith.constant 1.000000e+00 : f32
    %29 = vector.broadcast %cst_15 : f32 to vector<16x32xf32>
    %30 = arith.subf %29, %22 : vector<16x32xf32>
    %31 = arith.mulf %30, %0 : vector<16x32xf32>
    %32 = arith.mulf %22, %28 : vector<16x32xf32>
    %33 = arith.addf %31, %32 : vector<16x32xf32>
    %c0_16 = arith.constant 0 : index
    %c0_17 = arith.constant 0 : index
    %34 = vector.load %arg3[%c0_16, %c0_17] : memref<32x512xf32, #tpu.memory_space<vmem>>, vector<32x512xf32>
    %cst_18 = arith.constant dense<0.000000e+00> : vector<16x512xf32>
    %35 = tpu.matmul %33, %34, %cst_18 {dimension_numbers = #tpu.dot_dimension_numbers<[1], [0], [0], [1], [0, 0, 1, 1], [], []>} : vector<16x32xf32>, vector<32x512xf32>, vector<16x512xf32> -> vector<16x512xf32>
    %36 = vector.extract_strided_slice %35 {offsets = [0, 0], sizes = [16, 128], strides = [1, 1]} : vector<16x512xf32> to vector<16x128xf32>
    %37 = vector.extract_strided_slice %35 {offsets = [0, 128], sizes = [16, 128], strides = [1, 1]} : vector<16x512xf32> to vector<16x128xf32>
    %38 = vector.extract_strided_slice %35 {offsets = [0, 256], sizes = [16, 128], strides = [1, 1]} : vector<16x512xf32> to vector<16x128xf32>
    %39 = vector.extract_strided_slice %35 {offsets = [0, 384], sizes = [16, 128], strides = [1, 1]} : vector<16x512xf32> to vector<16x128xf32>
    %40 = tpu.concatenate %36, %37, %38, %39 in 0 : vector<16x128xf32>, vector<16x128xf32>, vector<16x128xf32>, vector<16x128xf32> -> vector<64x128xf32>
    %c0_19 = arith.constant 0 : index
    %c0_20 = arith.constant 0 : index
    %41 = vector.load %arg2[%c0_19, %c0_20] : memref<16x64xf32, #tpu.memory_space<vmem>>, vector<16x64xf32>
    %cst_21 = arith.constant dense<0.000000e+00> : vector<16x128xf32>
    %42 = tpu.matmul %41, %40, %cst_21 {dimension_numbers = #tpu.dot_dimension_numbers<[1], [0], [0], [1], [0, 0, 1, 1], [], []>} : vector<16x64xf32>, vector<64x128xf32>, vector<16x128xf32> -> vector<16x128xf32>
    %c0_22 = arith.constant 0 : index
    %c0_23 = arith.constant 0 : index
    %43 = vector.load %arg4[%c0_22, %c0_23] : memref<16x128xf32, #tpu.memory_space<vmem>>, vector<16x128xf32>
    %44 = arith.addf %42, %43 : vector<16x128xf32>
    %45 = vector.extract_strided_slice %44 {offsets = [0, 0], sizes = [16, 64], strides = [1, 1]} : vector<16x128xf32> to vector<16x64xf32>
    %c0_24 = arith.constant 0 : index
    %c0_25 = arith.constant 0 : index
    %46 = vector.load %arg5[%c0_24, %c0_25] : memref<32x64xf32, #tpu.memory_space<vmem>>, vector<32x64xf32>
    %cst_26 = arith.constant dense<0.000000e+00> : vector<16x64xf32>
    %47 = tpu.matmul %33, %46, %cst_26 {dimension_numbers = #tpu.dot_dimension_numbers<[1], [0], [0], [1], [0, 0, 1, 1], [], []>} : vector<16x32xf32>, vector<32x64xf32>, vector<16x64xf32> -> vector<16x64xf32>
    %48 = arith.addf %45, %47 : vector<16x64xf32>
    %49 = arith.negf %48 : vector<16x64xf32>
    %50 = math.exp %49 : vector<16x64xf32>
    %cst_27 = arith.constant 1.000000e+00 : f32
    %51 = vector.broadcast %cst_27 : f32 to vector<16x64xf32>
    %52 = arith.addf %51, %50 : vector<16x64xf32>
    %53 = arith.divf %51, %52 : vector<16x64xf32>
    %54 = vector.extract_strided_slice %53 {offsets = [0, 0], sizes = [16, 32], strides = [1, 1]} : vector<16x64xf32> to vector<16x32xf32>
    %55 = vector.extract_strided_slice %53 {offsets = [0, 32], sizes = [16, 32], strides = [1, 1]} : vector<16x64xf32> to vector<16x32xf32>
    %56 = vector.extract_strided_slice %44 {offsets = [0, 64], sizes = [16, 32], strides = [1, 1]} : vector<16x128xf32> to vector<16x32xf32>
    %57 = arith.mulf %54, %33 : vector<16x32xf32>
    %c0_28 = arith.constant 0 : index
    %c0_29 = arith.constant 0 : index
    %58 = vector.load %arg6[%c0_28, %c0_29] : memref<32x32xf32, #tpu.memory_space<vmem>>, vector<32x32xf32>
    %cst_30 = arith.constant dense<0.000000e+00> : vector<16x32xf32>
    %59 = tpu.matmul %57, %58, %cst_30 {dimension_numbers = #tpu.dot_dimension_numbers<[1], [0], [0], [1], [0, 0, 1, 1], [], []>} : vector<16x32xf32>, vector<32x32xf32>, vector<16x32xf32> -> vector<16x32xf32>
    %60 = arith.addf %56, %59 : vector<16x32xf32>
    %61 = math.tanh %60 : vector<16x32xf32>
    %cst_31 = arith.constant 1.000000e+00 : f32
    %62 = vector.broadcast %cst_31 : f32 to vector<16x32xf32>
    %63 = arith.subf %62, %55 : vector<16x32xf32>
    %64 = arith.mulf %63, %33 : vector<16x32xf32>
    %65 = arith.mulf %55, %61 : vector<16x32xf32>
    %66 = arith.addf %64, %65 : vector<16x32xf32>
    %c0_32 = arith.constant 0 : index
    %c0_33 = arith.constant 0 : index
    %67 = vector.load %arg3[%c0_32, %c0_33] : memref<32x512xf32, #tpu.memory_space<vmem>>, vector<32x512xf32>
    %cst_34 = arith.constant dense<0.000000e+00> : vector<16x512xf32>
    %68 = tpu.matmul %66, %67, %cst_34 {dimension_numbers = #tpu.dot_dimension_numbers<[1], [0], [0], [1], [0, 0, 1, 1], [], []>} : vector<16x32xf32>, vector<32x512xf32>, vector<16x512xf32> -> vector<16x512xf32>
    %69 = vector.extract_strided_slice %68 {offsets = [0, 0], sizes = [16, 128], strides = [1, 1]} : vector<16x512xf32> to vector<16x128xf32>
    %70 = vector.extract_strided_slice %68 {offsets = [0, 128], sizes = [16, 128], strides = [1, 1]} : vector<16x512xf32> to vector<16x128xf32>
    %71 = vector.extract_strided_slice %68 {offsets = [0, 256], sizes = [16, 128], strides = [1, 1]} : vector<16x512xf32> to vector<16x128xf32>
    %72 = vector.extract_strided_slice %68 {offsets = [0, 384], sizes = [16, 128], strides = [1, 1]} : vector<16x512xf32> to vector<16x128xf32>
    %73 = tpu.concatenate %69, %70, %71, %72 in 0 : vector<16x128xf32>, vector<16x128xf32>, vector<16x128xf32>, vector<16x128xf32> -> vector<64x128xf32>
    %c0_35 = arith.constant 0 : index
    %c0_36 = arith.constant 0 : index
    %74 = vector.load %arg2[%c0_35, %c0_36] : memref<16x64xf32, #tpu.memory_space<vmem>>, vector<16x64xf32>
    %cst_37 = arith.constant dense<0.000000e+00> : vector<16x128xf32>
    %75 = tpu.matmul %74, %73, %cst_37 {dimension_numbers = #tpu.dot_dimension_numbers<[1], [0], [0], [1], [0, 0, 1, 1], [], []>} : vector<16x64xf32>, vector<64x128xf32>, vector<16x128xf32> -> vector<16x128xf32>
    %c0_38 = arith.constant 0 : index
    %c0_39 = arith.constant 0 : index
    %76 = vector.load %arg4[%c0_38, %c0_39] : memref<16x128xf32, #tpu.memory_space<vmem>>, vector<16x128xf32>
    %77 = arith.addf %75, %76 : vector<16x128xf32>
    %78 = vector.extract_strided_slice %77 {offsets = [0, 0], sizes = [16, 64], strides = [1, 1]} : vector<16x128xf32> to vector<16x64xf32>
    %c0_40 = arith.constant 0 : index
    %c0_41 = arith.constant 0 : index
    %79 = vector.load %arg5[%c0_40, %c0_41] : memref<32x64xf32, #tpu.memory_space<vmem>>, vector<32x64xf32>
    %cst_42 = arith.constant dense<0.000000e+00> : vector<16x64xf32>
    %80 = tpu.matmul %66, %79, %cst_42 {dimension_numbers = #tpu.dot_dimension_numbers<[1], [0], [0], [1], [0, 0, 1, 1], [], []>} : vector<16x32xf32>, vector<32x64xf32>, vector<16x64xf32> -> vector<16x64xf32>
    %81 = arith.addf %78, %80 : vector<16x64xf32>
    %82 = arith.negf %81 : vector<16x64xf32>
    %83 = math.exp %82 : vector<16x64xf32>
    %cst_43 = arith.constant 1.000000e+00 : f32
    %84 = vector.broadcast %cst_43 : f32 to vector<16x64xf32>
    %85 = arith.addf %84, %83 : vector<16x64xf32>
    %86 = arith.divf %84, %85 : vector<16x64xf32>
    %87 = vector.extract_strided_slice %86 {offsets = [0, 0], sizes = [16, 32], strides = [1, 1]} : vector<16x64xf32> to vector<16x32xf32>
    %88 = vector.extract_strided_slice %86 {offsets = [0, 32], sizes = [16, 32], strides = [1, 1]} : vector<16x64xf32> to vector<16x32xf32>
    %89 = vector.extract_strided_slice %77 {offsets = [0, 64], sizes = [16, 32], strides = [1, 1]} : vector<16x128xf32> to vector<16x32xf32>
    %90 = arith.mulf %87, %66 : vector<16x32xf32>
    %c0_44 = arith.constant 0 : index
    %c0_45 = arith.constant 0 : index
    %91 = vector.load %arg6[%c0_44, %c0_45] : memref<32x32xf32, #tpu.memory_space<vmem>>, vector<32x32xf32>
    %cst_46 = arith.constant dense<0.000000e+00> : vector<16x32xf32>
    %92 = tpu.matmul %90, %91, %cst_46 {dimension_numbers = #tpu.dot_dimension_numbers<[1], [0], [0], [1], [0, 0, 1, 1], [], []>} : vector<16x32xf32>, vector<32x32xf32>, vector<16x32xf32> -> vector<16x32xf32>
    %93 = arith.addf %89, %92 : vector<16x32xf32>
    %94 = math.tanh %93 : vector<16x32xf32>
    %cst_47 = arith.constant 1.000000e+00 : f32
    %95 = vector.broadcast %cst_47 : f32 to vector<16x32xf32>
    %96 = arith.subf %95, %88 : vector<16x32xf32>
    %97 = arith.mulf %96, %66 : vector<16x32xf32>
    %98 = arith.mulf %88, %94 : vector<16x32xf32>
    %99 = arith.addf %97, %98 : vector<16x32xf32>
    %c0_48 = arith.constant 0 : index
    %c0_49 = arith.constant 0 : index
    %100 = vector.load %arg7[%c0_48, %c0_49] : memref<32x2xf32, #tpu.memory_space<vmem>>, vector<32x2xf32>
    %cst_50 = arith.constant dense<0.000000e+00> : vector<16x2xf32>
    %101 = tpu.matmul %99, %100, %cst_50 {dimension_numbers = #tpu.dot_dimension_numbers<[1], [0], [0], [1], [0, 0, 1, 1], [], []>} : vector<16x32xf32>, vector<32x2xf32>, vector<16x2xf32> -> vector<16x2xf32>
    %c0_51 = arith.constant 0 : index
    %c0_52 = arith.constant 0 : index
    %102 = vector.load %arg1[%c0_51, %c0_52] : memref<16x8xf32, #tpu.memory_space<vmem>>, vector<16x8xf32>
    %c0_53 = arith.constant 0 : index
    %c0_54 = arith.constant 0 : index
    %103 = vector.load %arg8[%c0_53, %c0_54] : memref<8x2xf32, #tpu.memory_space<vmem>>, vector<8x2xf32>
    %cst_55 = arith.constant dense<0.000000e+00> : vector<16x2xf32>
    %104 = tpu.matmul %102, %103, %cst_55 {dimension_numbers = #tpu.dot_dimension_numbers<[1], [0], [0], [1], [0, 0, 1, 1], [], []>} : vector<16x8xf32>, vector<8x2xf32>, vector<16x2xf32> -> vector<16x2xf32>
    %105 = arith.addf %101, %104 : vector<16x2xf32>
    %c0_56 = arith.constant 0 : index
    %c0_57 = arith.constant 0 : index
    %106 = vector.load %arg9[%c0_56, %c0_57] : memref<1x2xf32, #tpu.memory_space<vmem>>, vector<1x2xf32>
    %107 = vector.broadcast %106 : vector<1x2xf32> to vector<16x2xf32>
    %108 = arith.addf %105, %107 : vector<16x2xf32>
    %109 = vector.extract_strided_slice %108 {offsets = [0, 0], sizes = [16, 1], strides = [1, 1]} : vector<16x2xf32> to vector<16x1xf32>
    %110 = arith.negf %109 : vector<16x1xf32>
    %111 = math.exp %110 : vector<16x1xf32>
    %cst_58 = arith.constant 1.000000e+00 : f32
    %112 = vector.broadcast %cst_58 : f32 to vector<16x1xf32>
    %113 = arith.addf %112, %111 : vector<16x1xf32>
    %114 = arith.divf %112, %113 : vector<16x1xf32>
    %115 = vector.extract_strided_slice %108 {offsets = [0, 1], sizes = [16, 1], strides = [1, 1]} : vector<16x2xf32> to vector<16x1xf32>
    %116 = math.tanh %115 : vector<16x1xf32>
    %117 = arith.mulf %114, %116 : vector<16x1xf32>
    %c0_59 = arith.constant 0 : index
    %c0_60 = arith.constant 0 : index
    %118 = vector.load %arg10[%c0_59, %c0_60] : memref<2x16xf32, #tpu.memory_space<vmem>>, vector<2x16xf32>
    %cst_61 = arith.constant dense<0.000000e+00> : vector<2x1xf32>
    %119 = tpu.matmul %118, %117, %cst_61 {dimension_numbers = #tpu.dot_dimension_numbers<[1], [0], [0], [1], [0, 0, 1, 1], [], []>} : vector<2x16xf32>, vector<16x1xf32>, vector<2x1xf32> -> vector<2x1xf32>
    %120 = arith.negf %119 : vector<2x1xf32>
    %121 = math.exp %120 : vector<2x1xf32>
    %cst_62 = arith.constant 1.000000e+00 : f32
    %122 = vector.broadcast %cst_62 : f32 to vector<2x1xf32>
    %123 = arith.addf %122, %121 : vector<2x1xf32>
    %124 = arith.divf %122, %123 : vector<2x1xf32>
    %c0_63 = arith.constant 0 : index
    %c0_64 = arith.constant 0 : index
    %125 = vector.load %arg11[%c0_63, %c0_64] : memref<2x1xf32, #tpu.memory_space<vmem>>, vector<2x1xf32>
    tpu.vector_store %arg11[%c0_63, %c0_64], %124 {strides = array<i32>} : memref<2x1xf32, #tpu.memory_space<vmem>>, vector<2x1xf32>,
    return
  }
}

</mosaic_0001>

<bundles_post_ra>
// kernel: tpu_custom_call.1
= control target key start
LH: loop header
LB: loop body
LE: loop exit
PB: predicated region body
PF: predicated region fallthrough
CT: control target
= control target key end

     0   :  { %16 = vsyncpa [#allocation3], 0  ;;  %s1693_s0 = inlined_call_operand.vmem [shape: f32[16,32], index: 0, kind: input, shape index: {}]   ;;  %s1694_s1 = inlined_call_operand.vmem [shape: f32[16,8], index: 1, kind: input, shape index: {}]   ;;  %s1695_s2 = inlined_call_operand.hbm [shape: f32[16,64], index: 2, kind: input, shape index: {}]   ;;  %s1696_s3 = inlined_call_operand.hbm [shape: f32[32,512], index: 3, kind: input, shape index: {}]   ;;  %s1697_s4 = inlined_call_operand.hbm [shape: f32[16,128], index: 4, kind: input, shape index: {}]   ;;  %s1698_s5 = inlined_call_operand.vmem [shape: f32[32,64], index: 5, kind: input, shape index: {}]   ;;  %s1699_s6 = inlined_call_operand.hbm [shape: f32[32,32], index: 6, kind: input, shape index: {}]   ;;  %s1700_s7 = inlined_call_operand.vmem [shape: f32[32,2], index: 7, kind: input, shape index: {}]   ;;  %s1701_s8 = inlined_call_operand.vmem [shape: f32[8,2], index: 8, kind: input, shape index: {}]   ;;  %s1702_s9 = inlined_call_operand.vmem [shape: f32[1,2], index: 9, kind: input, shape index: {}]   ;;  %s1703_s10 = inlined_call_operand.vmem [shape: f32[2,16], index: 10, kind: input, shape index: {}]   ;;  %s1704_s11 = inlined_call_operand.vmem [shape: f32[2,1], index: 11, kind: output, shape index: {}]  }
   0x1   :  { %17 = vsyncpa [#allocation5], 0  ;;  %s40_s19 = sshll.u32 %s1696_s3, 4  ;;  %s41_s19 = int_to_ptr.hbm [resolvable:$true] %s40_s19 }
   0x2   :  { %18 = vsyncpa [#allocation8], 0  ;;  %s1287_s20 = smov [#allocation4]   ;;  %s27_s24 = sshll.u32 %s1695_s2, 4  ;;  %s28_s24 = int_to_ptr.hbm [resolvable:$true] %s27_s24 }
   0x3   :  { %s42_s21 = sshll.u32 %s1287_s20, 4  ;;  %s1288_s25 = smov 512   ;;  %s43_s21 = int_to_ptr.vmem [resolvable:$true] %s42_s21 }
   0x4   :  { %s1289_s26 = smov 32   ;;  %s1290_s27 = smov [#allocation2]  }
   0x5   :  { %48 = dma.hbm_to_vmem [thread:$0]  %s41_s19, 2048, %s43_s21, [#allocation5], %s1288_s25, %s1288_s25, %s1289_s26  }
   0x6   :  { %s29_s28 = sshll.u32 %s1290_s27, 4  ;;  %s1291_s29 = smov 128   ;;  %s30_s28 = int_to_ptr.vmem [resolvable:$true] %s29_s28 }
   0x7   :  { %s1292_s30 = smov 8   ;;  %s53_s13 = sshll.u32 %s1697_s4, 4  ;;  %s54_s13 = int_to_ptr.hbm [resolvable:$true] %s53_s13 }
   0x8   :  { %35 = dma.hbm_to_vmem [thread:$0]  %s28_s24, 256, %s30_s28, [#allocation3], %s1291_s29, %s1291_s29, %s1292_s30  }
   0x9   :  { %s1293_s14 = smov [#allocation6]   ;;  %s68_s17 = sshll.u32 %s1699_s6, 4  ;;  %s69_s17 = int_to_ptr.hbm [resolvable:$true] %s68_s17 }
   0xa   :  { %s55_s15 = sshll.u32 %s1293_s14, 4  ;;  %s1294_s18 = smov [#allocation7]   ;;  %s56_s15 = int_to_ptr.vmem [resolvable:$true] %s55_s15 }
   0xb   :  { %61 = dma.hbm_to_vmem [thread:$0]  %s54_s13, 256, %s56_s15, [#allocation5], %s1291_s29, %s1291_s29, %s1292_s30  }
   0xc   :  { %s70_s19 = sshll.u32 %s1294_s18, 4  ;;  %s71_s19 = int_to_ptr.vmem [resolvable:$true] %s70_s19 }
   0xd   :  { %76 = dma.hbm_to_vmem [thread:$0]  %s69_s17, 512, %s71_s19, [#allocation8], %s1291_s29, %s1291_s29, %s1292_s30  }
   0xe   :  { %1281 = dma.done.wait [#allocation3], 256  }
   0xf   :  { %1282 = vsyncadd [#allocation3], 4294967040 }
  0x10   :  { %1283 = dma.done.wait [#allocation5], 2304  }
  0x11   :  { %1284 = vsyncadd [#allocation5], 4294964992 }
  0x12   :  { %1285 = dma.done.wait [#allocation8], 512  }
  0x13   :  { %1286 = vsyncadd [#allocation8], 4294966784  ;;  %v1371_v0 = vld [vmem:[#allocation4 + $0x78] sm:$0xff]  ;;  %v1375_v2 = vld [vmem:[#allocation4 + $0x70] sm:$0xff]  ;;  %vm119_vm0 = vcmask 261120   ;;  %vm222_vm1 = vcmask 523264  }
  0x14   :  { %v1373_v1 = vld [vmem:[#allocation4 + $0x58] sm:$0xff]  ;;  %207 = vmatpush.msra.mxu3 %v1371_v0  ;;  %184 = vmatpush.msra.mxu2 %v1375_v2  ;;  %v1379_v3 = vld [vmem:[#allocation4 + $0x50] sm:$0xff]  ;;  %v1392_v7 = vld [vmem:[#allocation4 + $0x68] sm:$0xff]  ;;  %s1296_s29 = smov 96  }
  0x15   :  { %v1381_v4 = vld [vmem:[#allocation4 + $0x38] sm:$0xff]  ;;  %v1383_v5 = vld [vmem:[#allocation4 + $0x30] sm:$0xff]  ;;  %v1394_v8 = vld [vmem:[#allocation4 + $0x48] sm:$0xff]  ;;  %161 = vmatpush.msra.mxu1 %v1392_v7 }
  0x16   :  { %208 = vmatpush.msra.mxu3 %v1373_v1  ;;  %185 = vmatpush.msra.mxu2 %v1379_v3  ;;  %v1390_v6 = vld [vmem:[%s1693_s0] sm:$0xff]  ;;  %v1396_v9 = vld [vmem:[#allocation4 + $0x18] sm:$0xff]  ;;  %v1401_v11 = vld [vmem:[#allocation4 + $0x60] sm:$0xff] }
  0x17   :  { %v1398_v10 = vld [vmem:[#allocation4 + $0x10] sm:$0xff]  ;;  %368 = vrot.lane.b32.xlu1 %v1390_v6, %s1289_s26  ;;  %162 = vmatpush.msra.mxu1 %v1394_v8  ;;  %v1409_v12 = vld [vmem:[#allocation4 + $0x28] sm:$0xff]  ;;  %v1411_v13 = vld [vmem:[#allocation4 + $0x40] sm:$0xff] }
  0x18   :  { %209 = vmatpush.msra.mxu3 %v1381_v4  ;;  %186 = vmatpush.msra.mxu2 %v1383_v5  ;;  %v1419_v14 = vld [vmem:[#allocation4 + $0x8] sm:$0xff]  ;;  %v1421_v15 = vld [vmem:[#allocation4 + $0x20] sm:$0xff]  ;;  %v1426_v16 = vld [vmem:[%s1693_s0 + $0x8] sm:$0xff] }
  0x19   :  { %138 = vmatpush.msra.mxu0 %v1401_v11  ;;  %163 = vmatpush.msra.mxu1 %v1409_v12  ;;  %v1430_v17 = vld [vmem:[#allocation4] sm:$0xff]  ;;  %v1456_v18 = vld [vmem:[%s1698_s5 + $0x18] sm:$0xff]  ;;  %v1468_v20 = vld [vmem:[%s1698_s5 + $0x8] sm:$0xff] }
  0x1a   :  { %210 = vmatpush.msra.mxu3 %v1396_v9  ;;  %187 = vmatpush.msra.mxu2 %v1398_v10  ;;  %v1462_v19 = vld [vmem:[%s1698_s5 + $0x10] sm:$0xff]  ;;  %v1474_v21 = vld [vmem:[%s1698_s5] sm:$0xff]  ;;  %v1491_v31 = vld [vmem:[#allocation2 + $0x8] sm:$0xff]  ;;  %s1295_s5 = smov 64  }
  0x1b   :  { %1071 = vmatmul.msk.f32.vlgmr.msra.gmra.mxu3 %vm119_vm0, %v1390_v6  ;;  %1069 = vmatmul.msk.f32.vlgmr.msra.gmra.mxu2 %vm119_vm0, %v1390_v6  ;;  %v1485_v30 = vld [vmem:[#allocation2] sm:$0xff]  ;;  %v1501_v32 = vld [vmem:[#allocation7 + $0x18] sm:$0xff]  ;;  %v1505_v33 = vld [vmem:[#allocation7 + $0x10] sm:$0xff] }
  0x1c   :  { %139 = vmatpush.msra.mxu0 %v1411_v13  ;;  %370 = vrot.lane.b32.xlu2 %v1426_v16, %s1289_s26  ;;  %v1507_v34 = vld [vmem:[#allocation6] sm:$0xff]  ;;  %v1511_v36 = vld [vmem:[#allocation7 + $0x8] sm:$0xff]  ;;  %v1518_v39 = vld [vmem:[#allocation7] sm:$0xff] }
  0x1d   :  { %410 = vmatpush.msrb.mxu3 %v1401_v11  ;;  %164 = vmatpush.msra.mxu1 %v1419_v14  ;;  %v1525_v42 = vld [vmem:[#allocation6 + $0x8] sm:$0xff] }
  0x1e   :  { %140 = vmatpush.msra.mxu0 %v1421_v15  ;;  %1067 = vmatmul.msk.f32.vlgmr.msra.gmra.mxu1 %vm119_vm0, %v1390_v6 }
  0x1f   :  { %411 = vmatpush.msrb.mxu3 %v1411_v13  ;;  %268 = vmatpush.msrb.mxu1 %v1456_v18 }
  0x20   :  { %141 = vmatpush.msra.mxu0 %v1430_v17  ;;  %343 = vmatpush.msrb.mxu2 %v1501_v32 }
  0x21   :  { %1065 = vmatmul.msk.f32.vlgmr.msra.gmra.mxu0 %vm119_vm0, %v1390_v6  ;;  %412 = vmatpush.msrb.mxu3 %v1421_v15 }
  0x22   :  { %269 = vmatpush.msrb.mxu1 %v1462_v19  ;;  %344 = vmatpush.msrb.mxu2 %v1505_v33 }
  0x23   :  { %1072 = vmatmul.msk.f32.gmra.mxu3 %vm119_vm0, %v1426_v16  ;;  %1070 = vmatmul.msk.f32.gmra.mxu2 %vm119_vm0, %v1426_v16 }
  0x24   :  { %413 = vmatpush.msrb.mxu3 %v1430_v17  ;;  %270 = vmatpush.msrb.mxu1 %v1468_v20 }
  0x25   :  { %345 = vmatpush.msrb.mxu2 %v1511_v36 }
  0x26   :  { %1068 = vmatmul.msk.f32.gmra.mxu1 %vm119_vm0, %v1426_v16 }
  0x27   :  { %271 = vmatpush.msrb.mxu1 %v1474_v21  ;;  %346 = vmatpush.msrb.mxu2 %v1518_v39 }
  0x29   :  { %1066 = vmatmul.msk.f32.gmra.mxu0 %vm119_vm0, %v1426_v16  ;;  %456 = vmatpush.msra.mxu1 %v1375_v2 }
  0x2a   :  { %479 = vmatpush.msra.mxu2 %v1371_v0 }
  0x2b   :  { %457 = vmatpush.msra.mxu1 %v1379_v3 }
  0x2c   :  { %480 = vmatpush.msra.mxu2 %v1373_v1 }
  0x2d   :  { %458 = vmatpush.msra.mxu1 %v1383_v5 }
  0x2e   :  { %1075 = vmatmul.msk.f32.vlgmr.msrb.gmra.mxu1 %vm119_vm0, %v1390_v6  ;;  %481 = vmatpush.msra.mxu2 %v1381_v4 }
  0x2f   :  { %459 = vmatpush.msra.mxu1 %v1398_v10 }
  0x30   :  { %482 = vmatpush.msra.mxu2 %v1396_v9 }
  0x31   :  { %598 = vmatpush.msrb.mxu1 %v1501_v32 }
  0x33   :  { %599 = vmatpush.msrb.mxu1 %v1505_v33 }
  0x35   :  { %600 = vmatpush.msrb.mxu1 %v1511_v36 }
  0x36   :  { %1076 = vmatmul.msk.f32.gmra.mxu1 %vm119_vm0, %v1426_v16 }
  0x37   :  { %601 = vmatpush.msrb.mxu1 %v1518_v39 }
  0x9b   :  { %v166_v24 = vpop.f32.mrf.mxu1 }
  0x9e   :  { %v212_v22 = vpop.f32.mrf.mxu3  ;;  %v189_v23 = vpop.f32.mrf.mxu2 }
  0x9f   :  { %v143_v26 = vpop.f32.mrf.mxu0 }
  0xa3   :  { %v169_v28 = vpop.f32.mrf.mxu1 }
  0xa6   :  { %v215_v25 = vpop.f32.mrf.mxu3  ;;  %v192_v27 = vpop.f32.mrf.mxu2 }
  0xa7   :  { %237 = vmatpush.msrb.mxu0 %v215_v25  ;;  %v146_v29 = vpop.f32.mrf.mxu0 }
  0xa9   :  { %238 = vmatpush.msrb.mxu0 %v212_v22 }
  0xab   :  { %239 = vmatpush.msrb.mxu0 %v192_v27  ;;  %v273_v35 = vpop.f32.mrf.mxu1 }
  0xad   :  { %240 = vmatpush.msrb.mxu0 %v189_v23 }
  0xaf   :  { %241 = vmatpush.msrb.mxu0 %v169_v28 }
  0xb1   :  { %242 = vmatpush.msrb.mxu0 %v166_v24 }
  0xb3   :  { %243 = vmatpush.msrb.mxu0 %v146_v29  ;;  %v276_v44 = vpop.f32.mrf.mxu1 }
  0xb5   :  { %244 = vmatpush.msrb.mxu0 %v143_v26 }
  0xb6   :  { %1073 = vmatmul.msk.f32.vlgmr.msrb.gmra.mxu0 %vm222_vm1, %v1485_v30 }
  0xb7   :  { %433 = vmatpush.msra.mxu0 %v1392_v7 }
  0xb9   :  { %434 = vmatpush.msra.mxu0 %v1394_v8 }
  0xbb   :  { %435 = vmatpush.msra.mxu0 %v1409_v12 }
  0xbd   :  { %436 = vmatpush.msra.mxu0 %v1419_v14 }
  0xbe   :  { %1074 = vmatmul.msk.f32.gmra.mxu0 %vm222_vm1, %v1491_v31 }
  0xbf   :  { %525 = vmatpush.msrb.mxu0 %v1456_v18 }
  0xc1   :  { %526 = vmatpush.msrb.mxu0 %v1462_v19 }
  0xc3   :  { %527 = vmatpush.msrb.mxu0 %v1468_v20 }
  0xc5   :  { %528 = vmatpush.msrb.mxu0 %v1474_v21 }
 0x133   :  { %v246_v37 = vpop.f32.mrf.mxu0 }
 0x134   :  { %v1516_v38 = vadd.f32 %v246_v37, %v1507_v34 }
 0x136   :  { %v279_v40 = vadd.f32 %v273_v35, %v1516_v38 }
 0x138   :  { %v1077_v41 = vmul.f32 -1.442695, %v279_v40 }
 0x13a   :  { %1133 = vpow2.f32 %v1077_v41 }
 0x13b   :  { %v249_v43 = vpop.f32.mrf.mxu0 }
 0x13c   :  { %v250_v45 = vadd.f32 %v249_v43, %v1525_v42 }
 0x13e   :  { %v280_v46 = vadd.f32 %v276_v44, %v250_v45 }
 0x140   :  { %v1134_v47 = vpop.eup %1133  ;;  %v1078_v48 = vmul.f32 -1.442695, %v280_v46 }
 0x141   :  { %v287_v49 = vadd.f32 1.0, %v1134_v47 }
 0x142   :  { %1135 = vpow2.f32 %v1078_v48 }
 0x143   :  { %1137 = vrcp.f32 %v287_v49  ;;  %v300_v55 = vand.u32 2147483648, %v287_v49  ;;  %v298_v57 = vand.u32 2147483647, %v287_v49  ;;  %vm294_vm3 = vweird.f32 %v287_v49 }
 0x145   :  { %v301_v60 = vor.u32 1.1754944e-38, %v300_v55  ;;  %vm299_vm5 = vcmp.eq.f32.partialorder %v298_v57, 8.507059e+37 }
 0x148   :  { %v1136_v50 = vpop.eup %1135 }
 0x149   :  { %v1138_v51 = vpop.eup %1137  ;;  %v288_v52 = vadd.f32 1.0, %v1136_v50 }
 0x14a   :  { %v290_v53 = vmul.f32 %v1138_v51, %v287_v49  ;;  %vm295_vm2 = vweird.f32 %v1138_v51 }
 0x14b   :  { %1139 = vrcp.f32 %v288_v52  ;;  %vm296_vm4 = vmor %vm294_vm3, %vm295_vm2  ;;  %vm309_vm6 = vweird.f32 %v288_v52  ;;  %v315_v22 = vand.u32 2147483648, %v288_v52  ;;  %v313_v25 = vand.u32 2147483647, %v288_v52 }
 0x14c   :  { %v291_v54 = vsub.f32 1.0, %v290_v53 }
 0x14d   :  { %v316_v27 = vor.u32 1.1754944e-38, %v315_v22  ;;  %vm314_vm9 = vcmp.eq.f32.partialorder %v313_v25, 8.507059e+37 }
 0x14e   :  { %v292_v56 = vmul.f32 %v1138_v51, %v291_v54 }
 0x150   :  { %v293_v58 = vadd.f32 %v1138_v51, %v292_v56 }
 0x151   :  { %v1140_v59 = vpop.eup %1139 }
 0x152   :  { %v305_v61 = vmul.f32 %v1140_v59, %v288_v52  ;;  %v297_v62 = vsel %vm296_vm4, %v1138_v51, %v293_v58  ;;  %vm310_vm7 = vweird.f32 %v1140_v59 }
 0x153   :  { %v302_v63 = vsel %vm299_vm5, %v301_v60, %v297_v62  ;;  %vm311_vm8 = vmor %vm309_vm6, %vm310_vm7 }
 0x154   :  { %v306_v23 = vsub.f32 1.0, %v305_v61  ;;  %v319_v24 = vmul.f32 %v302_v63, %v1390_v6  ;;  %v366_v50 = vsub.f32 1.0, %v302_v63 }
 0x156   :  { %1079 = vmatmul.msk.f32.vlgmr.msrb.gmra.mxu2 %vm119_vm0, %v319_v24  ;;  %v307_v26 = vmul.f32 %v1140_v59, %v306_v23 }
 0x157   :  { %659 = vmatpush.msrb.mxu2 %v1401_v11 }
 0x158   :  { %v308_v28 = vadd.f32 %v1140_v59, %v307_v26 }
 0x159   :  { %660 = vmatpush.msrb.mxu2 %v1411_v13 }
 0x15a   :  { %v312_v29 = vsel %vm311_vm8, %v1140_v59, %v308_v28 }
 0x15b   :  { %v317_v35 = vsel %vm314_vm9, %v316_v27, %v312_v29  ;;  %661 = vmatpush.msrb.mxu2 %v1421_v15 }
 0x15c   :  { %v320_v37 = vmul.f32 %v317_v35, %v1426_v16  ;;  %v367_v44 = vsub.f32 1.0, %v317_v35 }
 0x15d   :  { %662 = vmatpush.msrb.mxu2 %v1430_v17  ;;  %v371_v17 = vpop.permute.xlu2 %370 }
 0x15e   :  { %1080 = vmatmul.msk.f32.gmra.mxu2 %vm119_vm0, %v320_v37  ;;  %v375_v47 = vmul.f32 %v371_v17, %v367_v44 }
 0x1d9   :  { %v348_v6 = vpop.f32.mrf.mxu2 }
 0x1da   :  { %356 = vrot.lane.b32.xlu0 %v348_v6, %s1295_s5 }
 0x1e1   :  { %v351_v40 = vpop.f32.mrf.mxu2 }
 0x1e2   :  { %358 = vrot.lane.b32.xlu0 %v351_v40, %s1295_s5 }
 0x24c   :  { %v357_v11 = vpop.permute.xlu0 %356 }
 0x24d   :  { %v362_v13 = vadd.f32 %v357_v11, %v1516_v38  ;;  %v369_v38 = vpop.permute.xlu1 %368 }
 0x24e   :  { %v374_v51 = vmul.f32 %v369_v38, %v366_v50 }
 0x24f   :  { %1141 = vtanh.f32 %v362_v13 }
 0x254   :  { %v359_v41 = vpop.permute.xlu0 %358 }
 0x255   :  { %v1142_v43 = vpop.eup %1141  ;;  %v363_v15 = vadd.f32 %v359_v41, %v250_v45 }
 0x256   :  { %378 = vrot.lane.b32.xlu1 %v1142_v43, %s1296_s29 }
 0x257   :  { %1143 = vtanh.f32 %v363_v15 }
 0x25d   :  { %v1144_v16 = vpop.eup %1143 }
 0x25e   :  { %380 = vrot.lane.b32.xlu2 %v1144_v16, %s1296_s29 }
 0x2b8   :  { %v381_v46 = vpop.permute.xlu2 %380 }
 0x2b9   :  { %v385_v48 = vmul.f32 %v381_v46, %v317_v35 }
 0x2bb   :  { %v1543_v49 = vadd.f32 %v385_v48, %v375_v47 }
 0x2bd   :  { %392 = vrot.lane.b32.xlu1 %v1543_v49, %s1296_s29 }
 0x2c8   :  { %v379_v45 = vpop.permute.xlu1 %378 }
 0x2c9   :  { %v384_v52 = vmul.f32 %v379_v45, %v302_v63 }
 0x2cb   :  { %v1547_v53 = vadd.f32 %v384_v52, %v374_v51 }
 0x2cd   :  { %390 = vrot.lane.b32.xlu0 %v1547_v53, %s1296_s29 }
 0x32f   :  { %v1567_v55 = vpop.permute.xlu1 %392 }
 0x33f   :  { %v1551_v54 = vpop.permute.xlu0 %390 }
 0x340   :  { %1081 = vmatmul.msk.f32.vlgmr.msrb.gmra.mxu3 %vm119_vm0, %v1551_v54  ;;  %1083 = vmatmul.msk.f32.vlgmr.msra.gmra.mxu0 %vm119_vm0, %v1551_v54 }
 0x341   :  { %1085 = vmatmul.msk.f32.vlgmr.msra.gmra.mxu1 %vm119_vm0, %v1551_v54  ;;  %1087 = vmatmul.msk.f32.vlgmr.msra.gmra.mxu2 %vm119_vm0, %v1551_v54 }
 0x342   :  { %728 = vmatpush.msra.mxu1 %v1371_v0  ;;  %705 = vmatpush.msra.mxu0 %v1375_v2 }
 0x344   :  { %706 = vmatpush.msra.mxu0 %v1379_v3  ;;  %729 = vmatpush.msra.mxu1 %v1373_v1 }
 0x346   :  { %707 = vmatpush.msra.mxu0 %v1383_v5  ;;  %730 = vmatpush.msra.mxu1 %v1381_v4 }
 0x348   :  { %1082 = vmatmul.msk.f32.gmra.mxu3 %vm119_vm0, %v1567_v55  ;;  %1084 = vmatmul.msk.f32.gmra.mxu0 %vm119_vm0, %v1567_v55 }
 0x349   :  { %1086 = vmatmul.msk.f32.gmra.mxu1 %vm119_vm0, %v1567_v55  ;;  %1088 = vmatmul.msk.f32.gmra.mxu2 %vm119_vm0, %v1567_v55 }
 0x34a   :  { %708 = vmatpush.msra.mxu0 %v1398_v10  ;;  %731 = vmatpush.msra.mxu1 %v1396_v9 }
 0x350   :  { %1091 = vmatmul.msk.f32.vlgmr.msrb.gmra.mxu0 %vm119_vm0, %v1551_v54 }
 0x351   :  { %847 = vmatpush.msrb.mxu0 %v1501_v32 }
 0x353   :  { %848 = vmatpush.msrb.mxu0 %v1505_v33 }
 0x355   :  { %849 = vmatpush.msrb.mxu0 %v1511_v36 }
 0x357   :  { %850 = vmatpush.msrb.mxu0 %v1518_v39 }
 0x358   :  { %1092 = vmatmul.msk.f32.gmra.mxu0 %vm119_vm0, %v1567_v55 }
 0x3bd   :  { %v438_v2 = vpop.f32.mrf.mxu0 }
 0x3be   :  { %v461_v1 = vpop.f32.mrf.mxu1 }
 0x3c3   :  { %v415_v4 = vpop.f32.mrf.mxu3 }
 0x3c4   :  { %v484_v0 = vpop.f32.mrf.mxu2 }
 0x3c5   :  { %v441_v9 = vpop.f32.mrf.mxu0 }
 0x3c6   :  { %v464_v5 = vpop.f32.mrf.mxu1 }
 0x3cb   :  { %v418_v10 = vpop.f32.mrf.mxu3 }
 0x3cc   :  { %v487_v3 = vpop.f32.mrf.mxu2 }
 0x3cd   :  { %498 = vmatpush.msra.mxu3 %v487_v3  ;;  %v530_v32 = vpop.f32.mrf.mxu0 }
 0x3cf   :  { %499 = vmatpush.msra.mxu3 %v484_v0 }
 0x3d1   :  { %500 = vmatpush.msra.mxu3 %v464_v5 }
 0x3d3   :  { %501 = vmatpush.msra.mxu3 %v461_v1 }
 0x3d5   :  { %502 = vmatpush.msra.mxu3 %v441_v9  ;;  %v533_v39 = vpop.f32.mrf.mxu0 }
 0x3d7   :  { %503 = vmatpush.msra.mxu3 %v438_v2 }
 0x3d9   :  { %504 = vmatpush.msra.mxu3 %v418_v10 }
 0x3db   :  { %505 = vmatpush.msra.mxu3 %v415_v4 }
 0x3dc   :  { %1089 = vmatmul.msk.f32.vlgmr.msra.gmra.mxu3 %vm222_vm1, %v1485_v30 }
 0x3dd   :  { %682 = vmatpush.msrb.mxu3 %v1392_v7 }
 0x3df   :  { %683 = vmatpush.msrb.mxu3 %v1394_v8 }
 0x3e1   :  { %684 = vmatpush.msrb.mxu3 %v1409_v12 }
 0x3e3   :  { %685 = vmatpush.msrb.mxu3 %v1419_v14 }
 0x3e4   :  { %1090 = vmatmul.msk.f32.gmra.mxu3 %vm222_vm1, %v1491_v31 }
 0x3e5   :  { %774 = vmatpush.msra.mxu3 %v1456_v18 }
 0x3e7   :  { %775 = vmatpush.msra.mxu3 %v1462_v19 }
 0x3e9   :  { %776 = vmatpush.msra.mxu3 %v1468_v20 }
 0x3eb   :  { %777 = vmatpush.msra.mxu3 %v1474_v21 }
 0x45f   :  { %v507_v33 = vpop.f32.mrf.mxu3 }
 0x460   :  { %v508_v7 = vadd.f32 %v507_v33, %v1507_v34 }
 0x462   :  { %v536_v8 = vadd.f32 %v530_v32, %v508_v7 }
 0x464   :  { %v1093_v36 = vmul.f32 -1.442695, %v536_v8 }
 0x466   :  { %1145 = vpow2.f32 %v1093_v36 }
 0x467   :  { %v510_v12 = vpop.f32.mrf.mxu3 }
 0x468   :  { %v511_v14 = vadd.f32 %v510_v12, %v1525_v42 }
 0x46a   :  { %v537_v56 = vadd.f32 %v533_v39, %v511_v14 }
 0x46c   :  { %v1146_v57 = vpop.eup %1145  ;;  %v1094_v18 = vmul.f32 -1.442695, %v537_v56 }
 0x46d   :  { %v544_v58 = vadd.f32 1.0, %v1146_v57 }
 0x46e   :  { %1147 = vpow2.f32 %v1094_v18 }
 0x46f   :  { %1149 = vrcp.f32 %v544_v58  ;;  %v557_v61 = vand.u32 2147483648, %v544_v58  ;;  %v555_v63 = vand.u32 2147483647, %v544_v58  ;;  %vm551_vm11 = vweird.f32 %v544_v58 }
 0x471   :  { %v558_v24 = vor.u32 1.1754944e-38, %v557_v61  ;;  %vm556_vm13 = vcmp.eq.f32.partialorder %v555_v63, 8.507059e+37 }
 0x474   :  { %v1148_v19 = vpop.eup %1147 }
 0x475   :  { %v1150_v20 = vpop.eup %1149  ;;  %v545_v21 = vadd.f32 1.0, %v1148_v19 }
 0x476   :  { %v547_v59 = vmul.f32 %v1150_v20, %v544_v58  ;;  %vm552_vm10 = vweird.f32 %v1150_v20 }
 0x477   :  { %1151 = vrcp.f32 %v545_v21  ;;  %vm553_vm12 = vmor %vm551_vm11, %vm552_vm10  ;;  %v572_v35 = vand.u32 2147483648, %v545_v21  ;;  %v570_v6 = vand.u32 2147483647, %v545_v21  ;;  %vm566_vm15 = vweird.f32 %v545_v21 }
 0x478   :  { %v548_v60 = vsub.f32 1.0, %v547_v59  ;;  %vm893_vm11 = vcmask 64512  }
 0x479   :  { %v573_v11 = vor.u32 1.1754944e-38, %v572_v35  ;;  %vm571_vm3 = vcmp.eq.f32.partialorder %v570_v6, 8.507059e+37 }
 0x47a   :  { %v549_v62 = vmul.f32 %v1150_v20, %v548_v60 }
 0x47c   :  { %v550_v22 = vadd.f32 %v1150_v20, %v549_v62 }
 0x47d   :  { %v1152_v23 = vpop.eup %1151 }
 0x47e   :  { %v554_v25 = vsel %vm553_vm12, %v1150_v20, %v550_v22  ;;  %v562_v26 = vmul.f32 %v1152_v23, %v545_v21  ;;  %vm567_vm14 = vweird.f32 %v1152_v23 }
 0x47f   :  { %v559_v27 = vsel %vm556_vm13, %v558_v24, %v554_v25  ;;  %vm568_vm2 = vmor %vm566_vm15, %vm567_vm14 }
 0x480   :  { %v578_v28 = vmul.f32 %v559_v27, %v1551_v54  ;;  %v563_v29 = vsub.f32 1.0, %v562_v26  ;;  %v621_v50 = vsub.f32 1.0, %v559_v27 }
 0x482   :  { %1095 = vmatmul.msk.f32.vlgmr.msrb.gmra.mxu1 %vm119_vm0, %v578_v28  ;;  %v564_v37 = vmul.f32 %v1152_v23, %v563_v29  ;;  %v623_v51 = vmul.f32 %v621_v50, %v1547_v53  ;;  %v889_v50 = vld [vmem:[%s1700_s7 + $0x18] sm:$0xff] }
 0x484   :  { %v565_v40 = vadd.f32 %v1152_v23, %v564_v37 }
 0x486   :  { %v569_v13 = vsel %vm568_vm2, %v1152_v23, %v565_v40 }
 0x487   :  { %v574_v41 = vsel %vm571_vm3, %v573_v11, %v569_v13 }
 0x488   :  { %v579_v43 = vmul.f32 %v574_v41, %v1567_v55  ;;  %v622_v55 = vsub.f32 1.0, %v574_v41 }
 0x48a   :  { %1096 = vmatmul.msk.f32.gmra.mxu1 %vm119_vm0, %v579_v43  ;;  %v624_v1 = vmul.f32 %v622_v55, %v1543_v49  ;;  %v886_v55 = vld [vmem:[%s1700_s7] sm:$0xff] }
 0x4ff   :  { %v603_v15 = vpop.f32.mrf.mxu1 }
 0x500   :  { %611 = vrot.lane.b32.xlu2 %v603_v15, %s1295_s5 }
 0x507   :  { %v606_v16 = vpop.f32.mrf.mxu1 }
 0x508   :  { %613 = vrot.lane.b32.xlu0 %v606_v16, %s1295_s5 }
 0x55a   :  { %v612_v17 = vpop.permute.xlu2 %611 }
 0x55b   :  { %v617_v44 = vadd.f32 %v612_v17, %v508_v7 }
 0x55d   :  { %1153 = vtanh.f32 %v617_v44 }
 0x563   :  { %v1154_v46 = vpop.eup %1153 }
 0x564   :  { %627 = vrot.lane.b32.xlu1 %v1154_v46, %s1296_s29 }
 0x57a   :  { %v614_v47 = vpop.permute.xlu0 %613 }
 0x57b   :  { %v618_v48 = vadd.f32 %v614_v47, %v511_v14 }
 0x57d   :  { %1155 = vtanh.f32 %v618_v48 }
 0x583   :  { %v1156_v38 = vpop.eup %1155 }
 0x584   :  { %629 = vrot.lane.b32.xlu2 %v1156_v38, %s1296_s29 }
 0x5d6   :  { %v628_v45 = vpop.permute.xlu1 %627 }
 0x5d7   :  { %v633_v52 = vmul.f32 %v628_v45, %v559_v27  ;;  %v888_v45 = vld [vmem:[%s1700_s7 + $0x10] sm:$0xff] }
 0x5d9   :  { %v1610_v54 = vadd.f32 %v633_v52, %v623_v51  ;;  %v892_v51 = vld [vmem:[%s1701_s8] sm:$0xff]  ;;  %v887_v52 = vld [vmem:[%s1700_s7 + $0x8] sm:$0xff] }
 0x5da   :  { %915 = vmatpush.msrb.mxu1 %v892_v51 }
 0x5db   :  { %639 = vrot.lane.b32.xlu0 %v1610_v54, %s1296_s29 }
 0x5de   :  { %v630_v0 = vpop.permute.xlu2 %629 }
 0x5df   :  { %v634_v2 = vmul.f32 %v630_v0, %v574_v41 }
 0x5e1   :  { %v1615_v3 = vadd.f32 %v634_v2, %v624_v1 }
 0x5e3   :  { %641 = vrot.lane.b32.xlu1 %v1615_v3, %s1296_s29 }
 0x64d   :  { %v1619_v4 = vpop.permute.xlu0 %639 }
 0x64e   :  { %1097 = vmatmul.msk.f32.vlgmr.msrb.gmra.mxu2 %vm119_vm0, %v1619_v4  ;;  %1099 = vmatmul.msk.f32.vlgmr.msrb.gmra.mxu3 %vm119_vm0, %v1619_v4 }
 0x64f   :  { %1101 = vmatmul.msk.f32.vlgmr.msra.gmra.mxu0 %vm119_vm0, %v1619_v4  ;;  %1103 = vmatmul.msk.f32.vlgmr.msra.gmra.mxu1 %vm119_vm0, %v1619_v4 }
 0x655   :  { %v1629_v49 = vpop.permute.xlu1 %641 }
 0x656   :  { %1098 = vmatmul.msk.f32.gmra.mxu2 %vm119_vm0, %v1629_v49  ;;  %1100 = vmatmul.msk.f32.gmra.mxu3 %vm119_vm0, %v1629_v49 }
 0x657   :  { %1102 = vmatmul.msk.f32.gmra.mxu0 %vm119_vm0, %v1629_v49  ;;  %1104 = vmatmul.msk.f32.gmra.mxu1 %vm119_vm0, %v1629_v49 }
 0x65e   :  { %1107 = vmatmul.msk.f32.vlgmr.msra.gmra.mxu3 %vm119_vm0, %v1619_v4 }
 0x666   :  { %1108 = vmatmul.msk.f32.gmra.mxu3 %vm119_vm0, %v1629_v49 }
 0x6cc   :  { %v733_v53 = vpop.f32.mrf.mxu1  ;;  %v710_v5 = vpop.f32.mrf.mxu0 }
 0x6d1   :  { %v687_v9 = vpop.f32.mrf.mxu3  ;;  %v664_v32 = vpop.f32.mrf.mxu2 }
 0x6d4   :  { %v736_v10 = vpop.f32.mrf.mxu1  ;;  %v713_v33 = vpop.f32.mrf.mxu0 }
 0x6d5   :  { %747 = vmatpush.msra.mxu2 %v736_v10 }
 0x6d7   :  { %748 = vmatpush.msra.mxu2 %v733_v53 }
 0x6d9   :  { %749 = vmatpush.msra.mxu2 %v713_v33  ;;  %v690_v7 = vpop.f32.mrf.mxu3  ;;  %v667_v8 = vpop.f32.mrf.mxu2  ;;  %v890_v33 = vld [vmem:[%s1694_s1] sm:$0xff] }
 0x6da   :  { %1113 = vmatmul.msk.f32.vlgmr.msrb.gmra.mxu1 %vm893_vm11, %v890_v33 }
 0x6db   :  { %750 = vmatpush.msra.mxu2 %v710_v5 }
 0x6dd   :  { %751 = vmatpush.msra.mxu2 %v690_v7 }
 0x6df   :  { %752 = vmatpush.msra.mxu2 %v687_v9 }
 0x6e1   :  { %753 = vmatpush.msra.mxu2 %v667_v8  ;;  %v779_v36 = vpop.f32.mrf.mxu3 }
 0x6e3   :  { %754 = vmatpush.msra.mxu2 %v664_v32 }
 0x6e4   :  { %1105 = vmatmul.msk.f32.vlgmr.msra.gmra.mxu2 %vm222_vm1, %v1485_v30 }
 0x6e5   :  { %945 = vmatpush.msrb.mxu2 %v889_v50 }
 0x6e7   :  { %946 = vmatpush.msrb.mxu2 %v888_v45 }
 0x6e9   :  { %v782_v58 = vpop.f32.mrf.mxu3  ;;  %947 = vmatpush.msrb.mxu2 %v887_v52 }
 0x6eb   :  { %948 = vmatpush.msrb.mxu2 %v886_v55 }
 0x6ec   :  { %1106 = vmatmul.msk.f32.gmra.mxu2 %vm222_vm1, %v1491_v31 }
 0x767   :  { %v756_v12 = vpop.f32.mrf.mxu2 }
 0x768   :  { %v757_v14 = vadd.f32 %v756_v12, %v1507_v34 }
 0x76a   :  { %v785_v39 = vadd.f32 %v779_v36, %v757_v14  ;;  %v1132_v36 = vld [vmem:[%s1702_s9] ss:$0 sm:$0xff] }
 0x76c   :  { %v1109_v56 = vmul.f32 -1.442695, %v785_v39 }
 0x76e   :  { %1157 = vpow2.f32 %v1109_v56 }
 0x76f   :  { %v759_v57 = vpop.f32.mrf.mxu2 }
 0x770   :  { %v760_v18 = vadd.f32 %v759_v57, %v1525_v42 }
 0x772   :  { %v786_v19 = vadd.f32 %v782_v58, %v760_v18 }
 0x774   :  { %v1158_v20 = vpop.eup %1157  ;;  %v1110_v21 = vmul.f32 -1.442695, %v786_v19 }
 0x775   :  { %v793_v59 = vadd.f32 1.0, %v1158_v20 }
 0x776   :  { %1159 = vpow2.f32 %v1110_v21 }
 0x777   :  { %1161 = vrcp.f32 %v793_v59  ;;  %v806_v34 = vand.u32 2147483648, %v793_v59  ;;  %v804_v22 = vand.u32 2147483647, %v793_v59  ;;  %vm800_vm4 = vweird.f32 %v793_v59 }
 0x779   :  { %v807_v24 = vor.u32 1.1754944e-38, %v806_v34  ;;  %vm805_vm6 = vcmp.eq.f32.partialorder %v804_v22, 8.507059e+37 }
 0x77c   :  { %v1160_v30 = vpop.eup %1159 }
 0x77d   :  { %v1162_v60 = vpop.eup %1161  ;;  %v794_v31 = vadd.f32 1.0, %v1160_v30 }
 0x77e   :  { %v796_v61 = vmul.f32 %v1162_v60, %v793_v59  ;;  %vm801_vm1 = vweird.f32 %v1162_v60 }
 0x77f   :  { %1163 = vrcp.f32 %v794_v31  ;;  %vm802_vm5 = vmor %vm800_vm4, %vm801_vm1  ;;  %v821_v35 = vand.u32 2147483648, %v794_v31  ;;  %v819_v6 = vand.u32 2147483647, %v794_v31  ;;  %vm815_vm8 = vweird.f32 %v794_v31 }
 0x780   :  { %v797_v62 = vsub.f32 1.0, %v796_v61  ;;  %vm1013_vm4 = vcmask 130048  }
 0x781   :  { %v822_v11 = vor.u32 1.1754944e-38, %v821_v35  ;;  %vm820_vm10 = vcmp.eq.f32.partialorder %v819_v6, 8.507059e+37 }
 0x782   :  { %v798_v63 = vmul.f32 %v1162_v60, %v797_v62 }
 0x784   :  { %v799_v23 = vadd.f32 %v1162_v60, %v798_v63 }
 0x785   :  { %v1164_v42 = vpop.eup %1163 }
 0x786   :  { %v803_v25 = vsel %vm802_vm5, %v1162_v60, %v799_v23  ;;  %v811_v26 = vmul.f32 %v1164_v42, %v794_v31  ;;  %vm816_vm7 = vweird.f32 %v1164_v42 }
 0x787   :  { %v808_v27 = vsel %vm805_vm6, %v807_v24, %v803_v25  ;;  %vm817_vm9 = vmor %vm815_vm8, %vm816_vm7  ;;  %vm1056_vm8 = vcmask 1024  }
 0x788   :  { %v827_v28 = vmul.f32 %v808_v27, %v1619_v4  ;;  %v812_v29 = vsub.f32 1.0, %v811_v26  ;;  %v870_v0 = vsub.f32 1.0, %v808_v27 }
 0x78a   :  { %1111 = vmatmul.msk.f32.vlgmr.msrb.gmra.mxu0 %vm119_vm0, %v827_v28  ;;  %v813_v37 = vmul.f32 %v1164_v42, %v812_v29  ;;  %v872_v2 = vmul.f32 %v870_v0, %v1610_v54  ;;  %v891_v54 = vld [vmem:[%s1694_s1 + $0x8] sm:$0xff]  ;;  %s1297_s1 = smov 127  }
 0x78b   :  { %1114 = vmatmul.msk.f32.gmra.mxu1 %vm893_vm11, %v891_v54 }
 0x78c   :  { %v814_v40 = vadd.f32 %v1164_v42, %v813_v37 }
 0x78e   :  { %v818_v13 = vsel %vm817_vm9, %v1164_v42, %v814_v40 }
 0x78f   :  { %v823_v41 = vsel %vm820_vm10, %v822_v11, %v818_v13 }
 0x790   :  { %v828_v43 = vmul.f32 %v823_v41, %v1629_v49  ;;  %v871_v53 = vsub.f32 1.0, %v823_v41 }
 0x792   :  { %1112 = vmatmul.msk.f32.gmra.mxu0 %vm119_vm0, %v828_v43  ;;  %v873_v9 = vmul.f32 %v871_v53, %v1615_v3  ;;  %v917_v3 = vpop.f32.mrf.mxu1 }
 0x807   :  { %v852_v15 = vpop.f32.mrf.mxu0 }
 0x808   :  { %860 = vrot.lane.b32.xlu2 %v852_v15, %s1295_s5  ;;  %v920_v56 = vpop.f32.mrf.mxu1 }
 0x80f   :  { %v855_v16 = vpop.f32.mrf.mxu0 }
 0x810   :  { %862 = vrot.lane.b32.xlu0 %v855_v16, %s1295_s5 }
 0x862   :  { %v861_v17 = vpop.permute.xlu2 %860 }
 0x863   :  { %v866_v44 = vadd.f32 %v861_v17, %v757_v14 }
 0x865   :  { %1165 = vtanh.f32 %v866_v44 }
 0x86b   :  { %v1166_v46 = vpop.eup %1165 }
 0x86c   :  { %876 = vrot.lane.b32.xlu1 %v1166_v46, %s1296_s29  ;;  %v1012_v46 = vld [vmem:[%s1703_s10] sm:$0x3] }
 0x882   :  { %v863_v47 = vpop.permute.xlu0 %862 }
 0x883   :  { %v867_v48 = vadd.f32 %v863_v47, %v760_v18 }
 0x885   :  { %1167 = vtanh.f32 %v867_v48 }
 0x88b   :  { %v1168_v38 = vpop.eup %1167 }
 0x88c   :  { %878 = vrot.lane.b32.xlu2 %v1168_v38, %s1296_s29 }
 0x8de   :  { %v877_v1 = vpop.permute.xlu1 %876 }
 0x8df   :  { %v882_v4 = vmul.f32 %v877_v1, %v808_v27 }
 0x8e1   :  { %v884_v49 = vadd.f32 %v882_v4, %v872_v2 }
 0x8e3   :  { %925 = vrot.lane.b32.xlu0 %v884_v49, %s1296_s29 }
 0x8e6   :  { %v879_v5 = vpop.permute.xlu2 %878 }
 0x8e7   :  { %v883_v10 = vmul.f32 %v879_v5, %v823_v41 }
 0x8e9   :  { %v885_v32 = vadd.f32 %v883_v10, %v873_v9 }
 0x8eb   :  { %927 = vrot.lane.b32.xlu1 %v885_v32, %s1296_s29 }
 0x955   :  { %v926_v7 = vpop.permute.xlu0 %925 }
 0x956   :  { %1115 = vmatmul.msk.f32.vlgmr.msrb.gmra.mxu2 %vm119_vm0, %v926_v7 }
 0x95d   :  { %v928_v8 = vpop.permute.xlu1 %927 }
 0x95e   :  { %1116 = vmatmul.msk.f32.gmra.mxu2 %vm119_vm0, %v928_v8 }
 0x9d9   :  { %v950_v12 = vpop.f32.mrf.mxu2 }
 0x9da   :  { %v951_v14 = vadd.f32 %v950_v12, %v917_v3 }
 0x9dc   :  { %v960_v39 = vadd.f32 %v1132_v36, %v951_v14 }
 0x9de   :  { %1169 = vtanh.f32 %v960_v39  ;;  %v1117_v60 = vmul.f32 -1.442695, %v960_v39 }
 0x9e1   :  { %v953_v57 = vpop.f32.mrf.mxu2 }
 0x9e2   :  { %v954_v18 = vadd.f32 %v953_v57, %v920_v56 }
 0x9e4   :  { %v1170_v58 = vpop.eup %1169  ;;  %v961_v19 = vadd.f32 %v1132_v36, %v954_v18 }
 0x9e5   :  { %1004 = vrot.lane.b32.xlu0 %v1170_v58, %s1297_s1 }
 0x9e6   :  { %1171 = vtanh.f32 %v961_v19  ;;  %v1118_v21 = vmul.f32 -1.442695, %v961_v19 }
 0x9e8   :  { %1173 = vpow2.f32 %v1118_v21 }
 0x9ec   :  { %v1172_v20 = vpop.eup %1171 }
 0x9ed   :  { %1006 = vrot.lane.b32.xlu2 %v1172_v20, %s1297_s1 }
 0x9ee   :  { %v1174_v59 = vpop.eup %1173 }
 0x9ef   :  { %v969_v30 = vadd.f32 1.0, %v1174_v59 }
 0x9f1   :  { %1175 = vrcp.f32 %v969_v30  ;;  %v996_v24 = vand.u32 2147483648, %v969_v30  ;;  %vm990_vm12 = vweird.f32 %v969_v30  ;;  %v994_v25 = vand.u32 2147483647, %v969_v30 }
 0x9f2   :  { %1177 = vpow2.f32 %v1117_v60 }
 0x9f3   :  { %v997_v28 = vor.u32 1.1754944e-38, %v996_v24  ;;  %vm995_vm14 = vcmp.eq.f32.partialorder %v994_v25, 8.507059e+37 }
 0x9f7   :  { %v1176_v31 = vpop.eup %1175 }
 0x9f8   :  { %v1178_v61 = vpop.eup %1177  ;;  %v986_v62 = vmul.f32 %v1176_v31, %v969_v30  ;;  %vm991_vm0 = vweird.f32 %v1176_v31 }
 0x9f9   :  { %v968_v34 = vadd.f32 1.0, %v1178_v61  ;;  %vm992_vm13 = vmor %vm990_vm12, %vm991_vm0 }
 0x9fa   :  { %v987_v63 = vsub.f32 1.0, %v986_v62 }
 0x9fb   :  { %1179 = vrcp.f32 %v968_v34  ;;  %v981_v13 = vand.u32 2147483648, %v968_v34  ;;  %vm975_vm2 = vweird.f32 %v968_v34  ;;  %v979_v41 = vand.u32 2147483647, %v968_v34 }
 0x9fc   :  { %v988_v22 = vmul.f32 %v1176_v31, %v987_v63 }
 0x9fd   :  { %v982_v15 = vor.u32 1.1754944e-38, %v981_v13  ;;  %vm980_vm1 = vcmp.eq.f32.partialorder %v979_v41, 8.507059e+37 }
 0x9fe   :  { %v989_v23 = vadd.f32 %v1176_v31, %v988_v22 }
 0xa00   :  { %v993_v26 = vsel %vm992_vm13, %v1176_v31, %v989_v23 }
 0xa01   :  { %v1180_v42 = vpop.eup %1179  ;;  %v998_v35 = vsel %vm995_vm14, %v997_v28, %v993_v26 }
 0xa02   :  { %v971_v27 = vmul.f32 %v1180_v42, %v968_v34  ;;  %vm976_vm15 = vweird.f32 %v1180_v42 }
 0xa03   :  { %vm977_vm3 = vmor %vm975_vm2, %vm976_vm15 }
 0xa04   :  { %v972_v6 = vsub.f32 1.0, %v971_v27 }
 0xa06   :  { %v973_v40 = vmul.f32 %v1180_v42, %v972_v6 }
 0xa08   :  { %v974_v11 = vadd.f32 %v1180_v42, %v973_v40 }
 0xa0a   :  { %v978_v43 = vsel %vm977_vm3, %v1180_v42, %v974_v11 }
 0xa0b   :  { %v983_v17 = vsel %vm980_vm1, %v982_v15, %v978_v43 }
 0xa47   :  { %v1007_v29 = vpop.permute.xlu2 %1006 }
 0xa48   :  { %v1011_v37 = vmul.f32 %v1007_v29, %v998_v35 }
 0xa4a   :  { %1031 = vmatpush.msrb.mxu3 %v1011_v37 }
 0xa57   :  { %v1005_v16 = vpop.permute.xlu0 %1004 }
 0xa58   :  { %v1010_v44 = vmul.f32 %v1005_v16, %v983_v17 }
 0xa5a   :  { %1032 = vmatpush.msrb.mxu3 %v1010_v44 }
 0xa5b   :  { %1119 = vmatmul.msk.f32.vlgmr.msrb.gmra.mxu3 %vm1013_vm4, %v1012_v46 }
 0xade   :  { %v1034_v47 = vpop.f32.mrf.mxu3 }
 0xadf   :  { %v1120_v48 = vmul.f32 -1.442695, %v1034_v47 }
 0xae1   :  { %1181 = vpow2.f32 %v1120_v48 }
 0xae7   :  { %v1182_v38 = vpop.eup %1181 }
 0xae8   :  { %v1040_v50 = vadd.f32 1.0, %v1182_v38 }
 0xaea   :  { %1183 = vrcp.f32 %v1040_v50  ;;  %v1052_v55 = vand.u32 2147483648, %v1040_v50  ;;  %v1050_v1 = vand.u32 2147483647, %v1040_v50  ;;  %vm1046_vm6 = vweird.f32 %v1040_v50 }
 0xaec   :  { %v1053_v4 = vor.u32 1.1754944e-38, %v1052_v55  ;;  %vm1051_vm9 = vcmp.eq.f32.partialorder %v1050_v1, 8.507059e+37 }
 0xaf0   :  { %v1184_v45 = vpop.eup %1183 }
 0xaf1   :  { %v1042_v51 = vmul.f32 %v1184_v45, %v1040_v50  ;;  %vm1047_vm5 = vweird.f32 %v1184_v45 }
 0xaf2   :  { %vm1048_vm7 = vmor %vm1046_vm6, %vm1047_vm5 }
 0xaf3   :  { %v1043_v52 = vsub.f32 1.0, %v1042_v51 }
 0xaf5   :  { %v1044_v0 = vmul.f32 %v1184_v45, %v1043_v52 }
 0xaf7   :  { %v1045_v2 = vadd.f32 %v1184_v45, %v1044_v0 }
 0xaf9   :  { %v1049_v49 = vsel %vm1048_vm7, %v1184_v45, %v1045_v2 }
 0xafa   :  { %v1054_v53 = vsel %vm1051_vm9, %v1053_v4, %v1049_v49 }
 0xafb   :  { %1057 = vst.msk [vmem:[%s1704_s11] sm:$0x3] %vm1056_vm8, %v1054_v53 }
 0xafc   :  { %1062 = vsyncpa [#allocation3], 1 }
 0xafd   :  { %1063 = vsyncpa [#allocation5], 1 }
 0xafe   :  { %1064 = vsyncpa [#allocation8], 1 }

</bundles_post_ra>
